<compile_context>
chip_gen: v6e
topology: v6e:2x2x1
jax: 0.10.0
libtpu: 0.0.40
codegen_flags: <defaults>
</compile_context>

<pallas_src>
import functools

import jax
import jax.numpy as jnp
from jax.experimental import pallas as pl
from jax.experimental.pallas import tpu as pltpu


_LN_EPS = 1e-6  # Seasonal_ext constructs nn.LayerNorm(..., eps=1e-06)


def _round_up(x, m):
    return ((x + m - 1) // m) * m


def _gelu_exact(x):
    # PyTorch nn.GELU() default = exact erf GELU (used only in precise mode).
    return 0.5 * x * (1.0 + jax.lax.erf(x * (2.0 ** -0.5)))


# --------------------------------------------------------------------------- #
# Kernel
# --------------------------------------------------------------------------- #
def seasonal_ext_kernel(
    x_ref,
    w1_ref, b1_ref,            # Gate: Linear(d, 2d)
    w2_ref, b2_ref,            # Gate: Linear(2d, d)
    wg_ref, bg_ref,            # Gate_out: Linear(d, d)
    g1_ref, be1_ref,           # norm1 (gamma, beta)
    wm1_ref, bm1_ref,          # MLP: Linear(d, 2d)
    wm2_ref, bm2_ref,          # MLP: Linear(2d, d)
    g2_ref, be2_ref,           # norm2 (gamma, beta)
    out_ref,
    *, d_model, n_sub, precise,
):
    rows = x_ref.shape[0]
    sub = rows // n_sub
    inv_d = jnp.float32(1.0 / d_model)
    mm_dt = jnp.float32 if precise else jnp.bfloat16

    def gelu(v):
        if precise:
            return _gelu_exact(v)
        # tanh form routes through the EUP (separate VLIW slot).
        return jax.nn.gelu(v, approximate=True)

    def layernorm(v, gamma, beta):
        # Padded feature lanes of v are exactly 0 (weights/biases are
        # zero-padded), so un-masked sums equal sums over the real d_model
        # lanes.  gamma/beta are zero-padded -> padded output lanes are 0.
        mean = jnp.sum(v, axis=-1, keepdims=True) * inv_d
        msq = jnp.sum(v * v, axis=-1, keepdims=True) * inv_d
        var = jnp.maximum(msq - mean * mean, 0.0)
        inv = jax.lax.rsqrt(var + _LN_EPS)
        return (v - mean) * inv * gamma + beta

    # Independent row sub-chunks: the LLO scheduler can overlap chunk k's
    # VPU/EUP/LN phases with chunk k+1's MXU matmuls.
    for c in range(n_sub):
        rs = pl.ds(c * sub, sub)
        x = x_ref[rs, :].astype(jnp.float32)

        # ---- Gate: Linear -> (Dropout = id) -> GELU -> Linear -> Sigmoid ----
        h = jnp.dot(x.astype(mm_dt), w1_ref[...],
                    preferred_element_type=jnp.float32) + b1_ref[...]
        h = gelu(h)
        gate_logits = jnp.dot(h.astype(mm_dt), w2_ref[...],
                              preferred_element_type=jnp.float32) + b2_ref[...]
        gate = jax.nn.sigmoid(gate_logits)

        # ---- Gate_out(inp * gate_weight) ----
        gated = x * gate
        gate_out = jnp.dot(gated.astype(mm_dt), wg_ref[...],
                           preferred_element_type=jnp.float32) + bg_ref[...]

        # ---- emb1 = LayerNorm1(gate_out + inp) ----
        emb1 = layernorm(gate_out + x, g1_ref[...], be1_ref[...])

        # ---- MLP: Linear -> (Dropout = id) -> GELU -> Linear ----
        m = jnp.dot(emb1.astype(mm_dt), wm1_ref[...],
                    preferred_element_type=jnp.float32) + bm1_ref[...]
        m = gelu(m)
        emb2 = jnp.dot(m.astype(mm_dt), wm2_ref[...],
                       preferred_element_type=jnp.float32) + bm2_ref[...]

        # ---- out = LayerNorm2(emb2 + emb1) ----
        out = layernorm(emb2 + emb1, g2_ref[...], be2_ref[...])
        out_ref[rs, :] = out.astype(out_ref.dtype)


# --------------------------------------------------------------------------- #
# Tiling / VMEM budgeting (generation-aware)
# --------------------------------------------------------------------------- #
_ROW_TILE_CANDIDATES = (1024, 512, 256, 128, 64, 32, 16, 8)


def _vmem_caps():
    """(tile budget, vmem_limit cap) derived from this chip's VMEM size."""
    default_cap = 64 * 1024 * 1024  # conservative: v7x has 64 MiB / TC
    try:
        info = pltpu.get_tpu_info()
        cap = int(getattr(info, "vmem_capacity_bytes", default_cap))
        if cap <= 0:
            cap = default_cap
    except Exception:
        cap = default_cap
    budget = max(24 * 1024 * 1024, cap - 16 * 1024 * 1024)
    limit_cap = max(32 * 1024 * 1024, cap - 8 * 1024 * 1024)
    return budget, limit_cap


def _choose_n_sub(row_tile):
    # Sub-chunks must be a multiple of 8 rows; don't bother splitting tiny tiles.
    if row_tile % 32 == 0 and row_tile >= 256:
        return 4
    if row_tile % 16 == 0 and row_tile >= 128:
        return 2
    return 1


def _vmem_bytes_estimate(row_tile, Dp, Hp, n_sub, w_bytes):
    f32 = 4
    io = 2 * 2 * row_tile * Dp * f32                     # x & out tiles, double-buffered
    wts = (2 * Dp * Hp + 2 * Hp * Dp + Dp * Dp) * w_bytes  # single-buffered weights
    vecs = (2 * Hp + 7 * Dp) * 8 * f32                   # (1, N) vectors pad to 8 sublanes
    sub = max(8, row_tile // max(1, n_sub))
    # ~2 sub-chunks of f32 activation temporaries live at once (overlap).
    act = 2 * sub * (2 * Hp + 5 * Dp) * f32
    return io + wts + vecs + act


def _choose_row_tile(R, Dp, Hp, budget, w_bytes):
    r_cap = max(8, _round_up(R, 8))
    best = 8
    for rt in _ROW_TILE_CANDIDATES:  # large -> small
        n_sub = _choose_n_sub(rt)
        if _vmem_bytes_estimate(rt, Dp, Hp, n_sub, w_bytes) <= budget:
            best = rt
            break
    # Largest fitting tile, clipped to the data size (no ">= 4 steps" shrink).
    return max(8, min(best, r_cap))


# --------------------------------------------------------------------------- #
# Wrapper
# --------------------------------------------------------------------------- #
def seasonal_ext_forward(x, params, *, row_tile=None, precise=False, io_dtype=None):
    """x: (B, S, D).  params: dict of (in, out)-oriented weights.

    precise=True  -> f32 MXU operands + exact erf GELU (strict PyTorch parity).
    io_dtype      -> optional streaming dtype for x/out (e.g. jnp.bfloat16).
    """
    B, S, D = x.shape
    R = B * S

    # Lane-dense padding of the feature / hidden dims to multiples of 128.
    Dp = _round_up(D, 128)
    Hp = _round_up(2 * D, 128)

    w_dt = jnp.float32 if precise else jnp.bfloat16
    w_bytes = 4 if precise else 2

    budget, limit_cap = _vmem_caps()
    if row_tile is None:
        row_tile = _choose_row_tile(R, Dp, Hp, budget, w_bytes)
    row_tile = max(8, _round_up(int(row_tile), 8))
    n_sub = _choose_n_sub(row_tile)

    io_dt = jnp.dtype(io_dtype) if io_dtype is not None else x.dtype

    # Rows are NOT padded: the last (partial) row block overhangs and its
    # stores are masked by the pipeline.  Only pad the feature dim if needed.
    x2 = x.reshape(R, D)
    if Dp != D:
        x2 = jnp.pad(x2, ((0, 0), (0, Dp - D)))
    if x2.dtype != io_dt:
        x2 = x2.astype(io_dt)

    f32 = jnp.float32

    def padw(a, rows, cols, dt):
        a = jnp.pad(a, ((0, rows - a.shape[0]), (0, cols - a.shape[1])))
        return a.astype(dt)

    pw = dict(
        w1=padw(params["w1"], Dp, Hp, w_dt), b1=padw(params["b1"], 1, Hp, f32),
        w2=padw(params["w2"], Hp, Dp, w_dt), b2=padw(params["b2"], 1, Dp, f32),
        wg=padw(params["wg"], Dp, Dp, w_dt), bg=padw(params["bg"], 1, Dp, f32),
        g1=padw(params["g1"], 1, Dp, f32), be1=padw(params["be1"], 1, Dp, f32),
        wm1=padw(params["wm1"], Dp, Hp, w_dt), bm1=padw(params["bm1"], 1, Hp, f32),
        wm2=padw(params["wm2"], Hp, Dp, w_dt), bm2=padw(params["bm2"], 1, Dp, f32),
        g2=padw(params["g2"], 1, Dp, f32), be2=padw(params["be2"], 1, Dp, f32),
    )

    # Weights / biases / LN params: whole-array, single-buffered VMEM residents.
    # Only the row-tiled activations are pipelined (double-buffered).
    vmem_resident = pl.BlockSpec(memory_space=pltpu.MemorySpace.VMEM)
    in_specs = ([pl.BlockSpec((row_tile, Dp), lambda i: (i, 0))]
                + [vmem_resident] * 14)
    out_spec = pl.BlockSpec((row_tile, Dp), lambda i: (i, 0))

    est = _vmem_bytes_estimate(row_tile, Dp, Hp, n_sub, w_bytes)
    vmem_limit = int(min(limit_cap, max(32 * 1024 * 1024, int(1.25 * est))))

    # TODO(synk): for very large d_model (f32-precise + Dp >= ~1024 on v7x),
    # K-block the Dp->Hp matmuls over a second 'arbitrary' grid axis instead of
    # shrinking row_tile; bf16 resident weights make this unnecessary here.
    out2 = pl.pallas_call(
        functools.partial(seasonal_ext_kernel, d_model=D, n_sub=n_sub,
                          precise=precise),
        out_shape=jax.ShapeDtypeStruct((R, Dp), io_dt),
        grid_spec=pl.GridSpec(
            grid=(pl.cdiv(R, row_tile),),
            in_specs=in_specs,
            out_specs=out_spec,
        ),
        compiler_params=pltpu.CompilerParams(
            dimension_semantics=("parallel",),
            vmem_limit_bytes=vmem_limit,
        ),
    )(
        x2,
        pw["w1"], pw["b1"], pw["w2"], pw["b2"],
        pw["wg"], pw["bg"], pw["g1"], pw["be1"],
        pw["wm1"], pw["bm1"], pw["wm2"], pw["bm2"],
        pw["g2"], pw["be2"],
    )

    out = out2 if Dp == D else out2[:, :D]
    out = out.reshape(B, S, D)
    if out.dtype != x.dtype:
        out = out.astype(x.dtype)
    return out


# --------------------------------------------------------------------------- #
# Synthetic params + pure-JAX reference
# --------------------------------------------------------------------------- #
def init_params(d_model, key):
    """Deterministic synthetic init (shapes from Seasonal_ext.__init__)."""
    D, D2 = d_model, 2 * d_model
    ks = jax.random.split(key, 10)
    scale = 0.05

    def w(k, shape):
        return (scale * jax.random.normal(k, shape)).astype(jnp.float32)

    return {
        # Gate = Linear(D, 2D) -> Dropout -> GELU -> Linear(2D, D) -> Sigmoid
        "w1": w(ks[0], (D, D2)), "b1": w(ks[1], (1, D2)),
        "w2": w(ks[2], (D2, D)), "b2": w(ks[3], (1, D)),
        # Gate_out = Linear(D, D)
        "wg": w(ks[4], (D, D)), "bg": w(ks[5], (1, D)),
        # norm1
        "g1": jnp.ones((1, D), jnp.float32), "be1": jnp.zeros((1, D), jnp.float32),
        # MLP = Linear(D, 2D) -> Dropout -> GELU -> Linear(2D, D)
        "wm1": w(ks[6], (D, D2)), "bm1": w(ks[7], (1, D2)),
        "wm2": w(ks[8], (D2, D)), "bm2": w(ks[9], (1, D)),
        # norm2
        "g2": jnp.ones((1, D), jnp.float32), "be2": jnp.zeros((1, D), jnp.float32),
    }


def reference_forward(x, p):
    """Pure-JAX f32 reference mirroring the PyTorch forward (dropout = id)."""
    def ln(v, g, b):
        mu = jnp.mean(v, -1, keepdims=True)
        vc = v - mu
        var = jnp.mean(vc * vc, -1, keepdims=True)
        return vc * jax.lax.rsqrt(var + _LN_EPS) * g + b

    h = _gelu_exact(x @ p["w1"] + p["b1"])
    gate = jax.nn.sigmoid(h @ p["w2"] + p["b2"])
    gate_out = (x * gate) @ p["wg"] + p["bg"]
    emb1 = ln(gate_out + x, p["g1"], p["be1"])
    emb2 = _gelu_exact(emb1 @ p["wm1"] + p["bm1"]) @ p["wm2"] + p["bm2"]
    return ln(emb2 + emb1, p["g2"], p["be2"])


if __name__ == "__main__":
    key = jax.random.PRNGKey(0)
    k_x, k_p = jax.random.split(key)

    B, S, D = 2, 8, 32          # batch=2, seq=8, d_model=32
    x = jax.random.normal(k_x, (B, S, D), dtype=jnp.float32)
    params = init_params(D, k_p)

    # Fast path: bf16 MXU operands + tanh GELU.
    out = seasonal_ext_forward(x, params)
    out = jax.block_until_ready(out)

    ref = reference_forward(x, params)
    assert out.shape == (B, S, D)
    assert bool(jnp.isfinite(out).all())
    max_err = float(jnp.max(jnp.abs(out - ref)))
    assert max_err < 3e-2, f"mismatch vs reference: max abs err {max_err}"

    print("KERNEL_OK")
</pallas_src>

<mosaic_0001>
module attributes {stable_mosaic.version = 11 : i64} {
  func.func @seasonal_ext_kernel(%arg0: i32, %arg1: memref<16x128xf32, #tpu.memory_space<vmem>>, %arg2: memref<128x128xbf16, #tpu.memory_space<vmem>>, %arg3: memref<1x128xf32, #tpu.memory_space<vmem>>, %arg4: memref<128x128xbf16, #tpu.memory_space<vmem>>, %arg5: memref<1x128xf32, #tpu.memory_space<vmem>>, %arg6: memref<128x128xbf16, #tpu.memory_space<vmem>>, %arg7: memref<1x128xf32, #tpu.memory_space<vmem>>, %arg8: memref<1x128xf32, #tpu.memory_space<vmem>>, %arg9: memref<1x128xf32, #tpu.memory_space<vmem>>, %arg10: memref<128x128xbf16, #tpu.memory_space<vmem>>, %arg11: memref<1x128xf32, #tpu.memory_space<vmem>>, %arg12: memref<128x128xbf16, #tpu.memory_space<vmem>>, %arg13: memref<1x128xf32, #tpu.memory_space<vmem>>, %arg14: memref<1x128xf32, #tpu.memory_space<vmem>>, %arg15: memref<1x128xf32, #tpu.memory_space<vmem>>, %arg16: memref<16x128xf32, #tpu.memory_space<vmem>>) attributes {dimension_semantics = [#tpu.dimension_semantics<parallel>], iteration_bounds = array<i64: 1>, scalar_prefetch = 0 : i64, scratch_operands = 0 : i64, tpu.core_type = #tpu.core_type<tc>, window_params = [{transform_indices = @transform_0, window_bounds = array<i64: 16, 128>}, {pipeline_mode = #tpu.pipeline_mode<synchronous>, transform_indices = @transform_1, window_bounds = array<i64: 128, 128>}, {pipeline_mode = #tpu.pipeline_mode<synchronous>, transform_indices = @transform_2, window_bounds = array<i64: 1, 128>}, {pipeline_mode = #tpu.pipeline_mode<synchronous>, transform_indices = @transform_3, window_bounds = array<i64: 128, 128>}, {pipeline_mode = #tpu.pipeline_mode<synchronous>, transform_indices = @transform_4, window_bounds = array<i64: 1, 128>}, {pipeline_mode = #tpu.pipeline_mode<synchronous>, transform_indices = @transform_5, window_bounds = array<i64: 128, 128>}, {pipeline_mode = #tpu.pipeline_mode<synchronous>, transform_indices = @transform_6, window_bounds = array<i64: 1, 128>}, {pipeline_mode = #tpu.pipeline_mode<synchronous>, transform_indices = @transform_7, window_bounds = array<i64: 1, 128>}, {pipeline_mode = #tpu.pipeline_mode<synchronous>, transform_indices = @transform_8, window_bounds = array<i64: 1, 128>}, {pipeline_mode = #tpu.pipeline_mode<synchronous>, transform_indices = @transform_9, window_bounds = array<i64: 128, 128>}, {pipeline_mode = #tpu.pipeline_mode<synchronous>, transform_indices = @transform_10, window_bounds = array<i64: 1, 128>}, {pipeline_mode = #tpu.pipeline_mode<synchronous>, transform_indices = @transform_11, window_bounds = array<i64: 128, 128>}, {pipeline_mode = #tpu.pipeline_mode<synchronous>, transform_indices = @transform_12, window_bounds = array<i64: 1, 128>}, {pipeline_mode = #tpu.pipeline_mode<synchronous>, transform_indices = @transform_13, window_bounds = array<i64: 1, 128>}, {pipeline_mode = #tpu.pipeline_mode<synchronous>, transform_indices = @transform_14, window_bounds = array<i64: 1, 128>}, {transform_indices = @transform_15, window_bounds = array<i64: 16, 128>}]} {
    %c0 = arith.constant 0 : index
    %c0_0 = arith.constant 0 : index
    %0 = vector.load %arg1[%c0, %c0_0] : memref<16x128xf32, #tpu.memory_space<vmem>>, vector<16x128xf32>
    %1 = arith.truncf %0 : vector<16x128xf32> to vector<16x128xbf16>
    %c0_1 = arith.constant 0 : index
    %c0_2 = arith.constant 0 : index
    %2 = vector.load %arg2[%c0_1, %c0_2] : memref<128x128xbf16, #tpu.memory_space<vmem>>, vector<128x128xbf16>
    %cst = arith.constant dense<0.000000e+00> : vector<16x128xf32>
    %3 = tpu.matmul %1, %2, %cst {dimension_numbers = #tpu.dot_dimension_numbers<[1], [0], [0], [1], [0, 0, 1, 1], [], []>} : vector<16x128xbf16>, vector<128x128xbf16>, vector<16x128xf32> -> vector<16x128xf32>
    %c0_3 = arith.constant 0 : index
    %c0_4 = arith.constant 0 : index
    %4 = vector.load %arg3[%c0_3, %c0_4] : memref<1x128xf32, #tpu.memory_space<vmem>>, vector<1x128xf32>
    %5 = vector.broadcast %4 : vector<1x128xf32> to vector<16x128xf32>
    %6 = arith.addf %3, %5 : vector<16x128xf32>
    %7 = arith.mulf %6, %6 : vector<16x128xf32>
    %8 = arith.mulf %6, %7 : vector<16x128xf32>
    %cst_5 = arith.constant 4.471500e-02 : f32
    %9 = vector.broadcast %cst_5 : f32 to vector<16x128xf32>
    %10 = arith.mulf %9, %8 : vector<16x128xf32>
    %11 = arith.addf %6, %10 : vector<16x128xf32>
    %cst_6 = arith.constant 0.797884583 : f32
    %12 = vector.broadcast %cst_6 : f32 to vector<16x128xf32>
    %13 = arith.mulf %12, %11 : vector<16x128xf32>
    %14 = math.tanh %13 : vector<16x128xf32>
    %cst_7 = arith.constant 1.000000e+00 : f32
    %15 = vector.broadcast %cst_7 : f32 to vector<16x128xf32>
    %16 = arith.addf %15, %14 : vector<16x128xf32>
    %cst_8 = arith.constant 5.000000e-01 : f32
    %17 = vector.broadcast %cst_8 : f32 to vector<16x128xf32>
    %18 = arith.mulf %17, %16 : vector<16x128xf32>
    %19 = arith.mulf %6, %18 : vector<16x128xf32>
    %20 = arith.truncf %19 : vector<16x128xf32> to vector<16x128xbf16>
    %c0_9 = arith.constant 0 : index
    %c0_10 = arith.constant 0 : index
    %21 = vector.load %arg4[%c0_9, %c0_10] : memref<128x128xbf16, #tpu.memory_space<vmem>>, vector<128x128xbf16>
    %cst_11 = arith.constant dense<0.000000e+00> : vector<16x128xf32>
    %22 = tpu.matmul %20, %21, %cst_11 {dimension_numbers = #tpu.dot_dimension_numbers<[1], [0], [0], [1], [0, 0, 1, 1], [], []>} : vector<16x128xbf16>, vector<128x128xbf16>, vector<16x128xf32> -> vector<16x128xf32>
    %c0_12 = arith.constant 0 : index
    %c0_13 = arith.constant 0 : index
    %23 = vector.load %arg5[%c0_12, %c0_13] : memref<1x128xf32, #tpu.memory_space<vmem>>, vector<1x128xf32>
    %24 = vector.broadcast %23 : vector<1x128xf32> to vector<16x128xf32>
    %25 = arith.addf %22, %24 : vector<16x128xf32>
    %26 = arith.negf %25 : vector<16x128xf32>
    %27 = math.exp %26 : vector<16x128xf32>
    %cst_14 = arith.constant 1.000000e+00 : f32
    %28 = vector.broadcast %cst_14 : f32 to vector<16x128xf32>
    %29 = arith.addf %28, %27 : vector<16x128xf32>
    %30 = arith.divf %28, %29 : vector<16x128xf32>
    %31 = arith.mulf %0, %30 : vector<16x128xf32>
    %32 = arith.truncf %31 : vector<16x128xf32> to vector<16x128xbf16>
    %c0_15 = arith.constant 0 : index
    %c0_16 = arith.constant 0 : index
    %33 = vector.load %arg6[%c0_15, %c0_16] : memref<128x128xbf16, #tpu.memory_space<vmem>>, vector<128x128xbf16>
    %cst_17 = arith.constant dense<0.000000e+00> : vector<16x128xf32>
    %34 = tpu.matmul %32, %33, %cst_17 {dimension_numbers = #tpu.dot_dimension_numbers<[1], [0], [0], [1], [0, 0, 1, 1], [], []>} : vector<16x128xbf16>, vector<128x128xbf16>, vector<16x128xf32> -> vector<16x128xf32>
    %c0_18 = arith.constant 0 : index
    %c0_19 = arith.constant 0 : index
    %35 = vector.load %arg7[%c0_18, %c0_19] : memref<1x128xf32, #tpu.memory_space<vmem>>, vector<1x128xf32>
    %36 = vector.broadcast %35 : vector<1x128xf32> to vector<16x128xf32>
    %37 = arith.addf %34, %36 : vector<16x128xf32>
    %38 = arith.addf %37, %0 : vector<16x128xf32>
    %c0_20 = arith.constant 0 : index
    %c0_21 = arith.constant 0 : index
    %39 = vector.load %arg8[%c0_20, %c0_21] : memref<1x128xf32, #tpu.memory_space<vmem>>, vector<1x128xf32>
    %c0_22 = arith.constant 0 : index
    %c0_23 = arith.constant 0 : index
    %40 = vector.load %arg9[%c0_22, %c0_23] : memref<1x128xf32, #tpu.memory_space<vmem>>, vector<1x128xf32>
    %cst_24 = arith.constant dense<0.000000e+00> : vector<16xf32>
    %41 = vector.multi_reduction <add>, %38, %cst_24 [1] : vector<16x128xf32> to vector<16xf32>
    %42 = vector.shape_cast %41 : vector<16xf32> to vector<16x1xf32>
    %cst_25 = arith.constant 3.125000e-02 : f32
    %43 = vector.broadcast %cst_25 : f32 to vector<16x1xf32>
    %44 = arith.mulf %42, %43 : vector<16x1xf32>
    %45 = arith.mulf %38, %38 : vector<16x128xf32>
    %cst_26 = arith.constant dense<0.000000e+00> : vector<16xf32>
    %46 = vector.multi_reduction <add>, %45, %cst_26 [1] : vector<16x128xf32> to vector<16xf32>
    %47 = vector.shape_cast %46 : vector<16xf32> to vector<16x1xf32>
    %cst_27 = arith.constant 3.125000e-02 : f32
    %48 = vector.broadcast %cst_27 : f32 to vector<16x1xf32>
    %49 = arith.mulf %47, %48 : vector<16x1xf32>
    %50 = arith.mulf %44, %44 : vector<16x1xf32>
    %51 = arith.subf %49, %50 : vector<16x1xf32>
    %cst_28 = arith.constant 0.000000e+00 : f32
    %52 = vector.broadcast %cst_28 : f32 to vector<16x1xf32>
    %53 = arith.maximumf %51, %52 : vector<16x1xf32>
    %cst_29 = arith.constant 9.99999997E-7 : f32
    %54 = vector.broadcast %cst_29 : f32 to vector<16x1xf32>
    %55 = arith.addf %53, %54 : vector<16x1xf32>
    %56 = math.rsqrt %55 : vector<16x1xf32>
    %57 = vector.broadcast %44 : vector<16x1xf32> to vector<16x128xf32>
    %58 = arith.subf %38, %57 : vector<16x128xf32>
    %59 = vector.broadcast %56 : vector<16x1xf32> to vector<16x128xf32>
    %60 = arith.mulf %58, %59 : vector<16x128xf32>
    %61 = vector.broadcast %39 : vector<1x128xf32> to vector<16x128xf32>
    %62 = arith.mulf %60, %61 : vector<16x128xf32>
    %63 = vector.broadcast %40 : vector<1x128xf32> to vector<16x128xf32>
    %64 = arith.addf %62, %63 : vector<16x128xf32>
    %65 = arith.truncf %64 : vector<16x128xf32> to vector<16x128xbf16>
    %c0_30 = arith.constant 0 : index
    %c0_31 = arith.constant 0 : index
    %66 = vector.load %arg10[%c0_30, %c0_31] : memref<128x128xbf16, #tpu.memory_space<vmem>>, vector<128x128xbf16>
    %cst_32 = arith.constant dense<0.000000e+00> : vector<16x128xf32>
    %67 = tpu.matmul %65, %66, %cst_32 {dimension_numbers = #tpu.dot_dimension_numbers<[1], [0], [0], [1], [0, 0, 1, 1], [], []>} : vector<16x128xbf16>, vector<128x128xbf16>, vector<16x128xf32> -> vector<16x128xf32>
    %c0_33 = arith.constant 0 : index
    %c0_34 = arith.constant 0 : index
    %68 = vector.load %arg11[%c0_33, %c0_34] : memref<1x128xf32, #tpu.memory_space<vmem>>, vector<1x128xf32>
    %69 = vector.broadcast %68 : vector<1x128xf32> to vector<16x128xf32>
    %70 = arith.addf %67, %69 : vector<16x128xf32>
    %71 = arith.mulf %70, %70 : vector<16x128xf32>
    %72 = arith.mulf %70, %71 : vector<16x128xf32>
    %cst_35 = arith.constant 4.471500e-02 : f32
    %73 = vector.broadcast %cst_35 : f32 to vector<16x128xf32>
    %74 = arith.mulf %73, %72 : vector<16x128xf32>
    %75 = arith.addf %70, %74 : vector<16x128xf32>
    %cst_36 = arith.constant 0.797884583 : f32
    %76 = vector.broadcast %cst_36 : f32 to vector<16x128xf32>
    %77 = arith.mulf %76, %75 : vector<16x128xf32>
    %78 = math.tanh %77 : vector<16x128xf32>
    %cst_37 = arith.constant 1.000000e+00 : f32
    %79 = vector.broadcast %cst_37 : f32 to vector<16x128xf32>
    %80 = arith.addf %79, %78 : vector<16x128xf32>
    %cst_38 = arith.constant 5.000000e-01 : f32
    %81 = vector.broadcast %cst_38 : f32 to vector<16x128xf32>
    %82 = arith.mulf %81, %80 : vector<16x128xf32>
    %83 = arith.mulf %70, %82 : vector<16x128xf32>
    %84 = arith.truncf %83 : vector<16x128xf32> to vector<16x128xbf16>
    %c0_39 = arith.constant 0 : index
    %c0_40 = arith.constant 0 : index
    %85 = vector.load %arg12[%c0_39, %c0_40] : memref<128x128xbf16, #tpu.memory_space<vmem>>, vector<128x128xbf16>
    %cst_41 = arith.constant dense<0.000000e+00> : vector<16x128xf32>
    %86 = tpu.matmul %84, %85, %cst_41 {dimension_numbers = #tpu.dot_dimension_numbers<[1], [0], [0], [1], [0, 0, 1, 1], [], []>} : vector<16x128xbf16>, vector<128x128xbf16>, vector<16x128xf32> -> vector<16x128xf32>
    %c0_42 = arith.constant 0 : index
    %c0_43 = arith.constant 0 : index
    %87 = vector.load %arg13[%c0_42, %c0_43] : memref<1x128xf32, #tpu.memory_space<vmem>>, vector<1x128xf32>
    %88 = vector.broadcast %87 : vector<1x128xf32> to vector<16x128xf32>
    %89 = arith.addf %86, %88 : vector<16x128xf32>
    %90 = arith.addf %89, %64 : vector<16x128xf32>
    %c0_44 = arith.constant 0 : index
    %c0_45 = arith.constant 0 : index
    %91 = vector.load %arg14[%c0_44, %c0_45] : memref<1x128xf32, #tpu.memory_space<vmem>>, vector<1x128xf32>
    %c0_46 = arith.constant 0 : index
    %c0_47 = arith.constant 0 : index
    %92 = vector.load %arg15[%c0_46, %c0_47] : memref<1x128xf32, #tpu.memory_space<vmem>>, vector<1x128xf32>
    %cst_48 = arith.constant dense<0.000000e+00> : vector<16xf32>
    %93 = vector.multi_reduction <add>, %90, %cst_48 [1] : vector<16x128xf32> to vector<16xf32>
    %94 = vector.shape_cast %93 : vector<16xf32> to vector<16x1xf32>
    %cst_49 = arith.constant 3.125000e-02 : f32
    %95 = vector.broadcast %cst_49 : f32 to vector<16x1xf32>
    %96 = arith.mulf %94, %95 : vector<16x1xf32>
    %97 = arith.mulf %90, %90 : vector<16x128xf32>
    %cst_50 = arith.constant dense<0.000000e+00> : vector<16xf32>
    %98 = vector.multi_reduction <add>, %97, %cst_50 [1] : vector<16x128xf32> to vector<16xf32>
    %99 = vector.shape_cast %98 : vector<16xf32> to vector<16x1xf32>
    %cst_51 = arith.constant 3.125000e-02 : f32
    %100 = vector.broadcast %cst_51 : f32 to vector<16x1xf32>
    %101 = arith.mulf %99, %100 : vector<16x1xf32>
    %102 = arith.mulf %96, %96 : vector<16x1xf32>
    %103 = arith.subf %101, %102 : vector<16x1xf32>
    %cst_52 = arith.constant 0.000000e+00 : f32
    %104 = vector.broadcast %cst_52 : f32 to vector<16x1xf32>
    %105 = arith.maximumf %103, %104 : vector<16x1xf32>
    %cst_53 = arith.constant 9.99999997E-7 : f32
    %106 = vector.broadcast %cst_53 : f32 to vector<16x1xf32>
    %107 = arith.addf %105, %106 : vector<16x1xf32>
    %108 = math.rsqrt %107 : vector<16x1xf32>
    %109 = vector.broadcast %96 : vector<16x1xf32> to vector<16x128xf32>
    %110 = arith.subf %90, %109 : vector<16x128xf32>
    %111 = vector.broadcast %108 : vector<16x1xf32> to vector<16x128xf32>
    %112 = arith.mulf %110, %111 : vector<16x128xf32>
    %113 = vector.broadcast %91 : vector<1x128xf32> to vector<16x128xf32>
    %114 = arith.mulf %112, %113 : vector<16x128xf32>
    %115 = vector.broadcast %92 : vector<1x128xf32> to vector<16x128xf32>
    %116 = arith.addf %114, %115 : vector<16x128xf32>
    %c0_54 = arith.constant 0 : index
    %c0_55 = arith.constant 0 : index
    %117 = vector.load %arg16[%c0_54, %c0_55] : memref<16x128xf32, #tpu.memory_space<vmem>>, vector<16x128xf32>
    tpu.vector_store %arg16[%c0_54, %c0_55], %116 {strides = array<i32>} : memref<16x128xf32, #tpu.memory_space<vmem>>, vector<16x128xf32>,
    return
  }
  func.func @transform_0(%arg0: i32) -> (i32, i32) {
    %c0_i32 = arith.constant 0 : i32
    %c0_i32_0 = arith.constant 0 : i32
    return %arg0, %c0_i32 : i32, i32
  }
  func.func @transform_1(%arg0: i32) -> (i32, i32) {
    %c0_i32 = arith.constant 0 : i32
    %c0_i32_0 = arith.constant 0 : i32
    %c0_i32_1 = arith.constant 0 : i32
    return %c0_i32, %c0_i32_0 : i32, i32
  }
  func.func @transform_2(%arg0: i32) -> (i32, i32) {
    %c0_i32 = arith.constant 0 : i32
    %c0_i32_0 = arith.constant 0 : i32
    %c0_i32_1 = arith.constant 0 : i32
    return %c0_i32, %c0_i32_0 : i32, i32
  }
  func.func @transform_3(%arg0: i32) -> (i32, i32) {
    %c0_i32 = arith.constant 0 : i32
    %c0_i32_0 = arith.constant 0 : i32
    %c0_i32_1 = arith.constant 0 : i32
    return %c0_i32, %c0_i32_0 : i32, i32
  }
  func.func @transform_4(%arg0: i32) -> (i32, i32) {
    %c0_i32 = arith.constant 0 : i32
    %c0_i32_0 = arith.constant 0 : i32
    %c0_i32_1 = arith.constant 0 : i32
    return %c0_i32, %c0_i32_0 : i32, i32
  }
  func.func @transform_5(%arg0: i32) -> (i32, i32) {
    %c0_i32 = arith.constant 0 : i32
    %c0_i32_0 = arith.constant 0 : i32
    %c0_i32_1 = arith.constant 0 : i32
    return %c0_i32, %c0_i32_0 : i32, i32
  }
  func.func @transform_6(%arg0: i32) -> (i32, i32) {
    %c0_i32 = arith.constant 0 : i32
    %c0_i32_0 = arith.constant 0 : i32
    %c0_i32_1 = arith.constant 0 : i32
    return %c0_i32, %c0_i32_0 : i32, i32
  }
  func.func @transform_7(%arg0: i32) -> (i32, i32) {
    %c0_i32 = arith.constant 0 : i32
    %c0_i32_0 = arith.constant 0 : i32
    %c0_i32_1 = arith.constant 0 : i32
    return %c0_i32, %c0_i32_0 : i32, i32
  }
  func.func @transform_8(%arg0: i32) -> (i32, i32) {
    %c0_i32 = arith.constant 0 : i32
    %c0_i32_0 = arith.constant 0 : i32
    %c0_i32_1 = arith.constant 0 : i32
    return %c0_i32, %c0_i32_0 : i32, i32
  }
  func.func @transform_9(%arg0: i32) -> (i32, i32) {
    %c0_i32 = arith.constant 0 : i32
    %c0_i32_0 = arith.constant 0 : i32
    %c0_i32_1 = arith.constant 0 : i32
    return %c0_i32, %c0_i32_0 : i32, i32
  }
  func.func @transform_10(%arg0: i32) -> (i32, i32) {
    %c0_i32 = arith.constant 0 : i32
    %c0_i32_0 = arith.constant 0 : i32
    %c0_i32_1 = arith.constant 0 : i32
    return %c0_i32, %c0_i32_0 : i32, i32
  }
  func.func @transform_11(%arg0: i32) -> (i32, i32) {
    %c0_i32 = arith.constant 0 : i32
    %c0_i32_0 = arith.constant 0 : i32
    %c0_i32_1 = arith.constant 0 : i32
    return %c0_i32, %c0_i32_0 : i32, i32
  }
  func.func @transform_12(%arg0: i32) -> (i32, i32) {
    %c0_i32 = arith.constant 0 : i32
    %c0_i32_0 = arith.constant 0 : i32
    %c0_i32_1 = arith.constant 0 : i32
    return %c0_i32, %c0_i32_0 : i32, i32
  }
  func.func @transform_13(%arg0: i32) -> (i32, i32) {
    %c0_i32 = arith.constant 0 : i32
    %c0_i32_0 = arith.constant 0 : i32
    %c0_i32_1 = arith.constant 0 : i32
    return %c0_i32, %c0_i32_0 : i32, i32
  }
  func.func @transform_14(%arg0: i32) -> (i32, i32) {
    %c0_i32 = arith.constant 0 : i32
    %c0_i32_0 = arith.constant 0 : i32
    %c0_i32_1 = arith.constant 0 : i32
    return %c0_i32, %c0_i32_0 : i32, i32
  }
  func.func @transform_15(%arg0: i32) -> (i32, i32) {
    %c0_i32 = arith.constant 0 : i32
    %c0_i32_0 = arith.constant 0 : i32
    return %arg0, %c0_i32 : i32, i32
  }
}

</mosaic_0001>

<bundles_post_ra>
// kernel: tpu_custom_call.1
= control target key start
LH: loop header
LB: loop body
LE: loop exit
PB: predicated region body
PF: predicated region fallthrough
CT: control target
= control target key end

     0   :  { %20 = vsyncpa [#allocation3], 0  ;;  %s1518_s0 = inlined_call_operand.hbm [shape: f32[16,128], index: 0, kind: input, shape index: {}]   ;;  %s1519_s1 = inlined_call_operand.hbm [shape: bf16[128,128], index: 1, kind: input, shape index: {}]   ;;  %s1520_s2 = inlined_call_operand.vmem [shape: f32[1,128], index: 2, kind: input, shape index: {}]   ;;  %s1521_s3 = inlined_call_operand.hbm [shape: bf16[128,128], index: 3, kind: input, shape index: {}]   ;;  %s1522_s4 = inlined_call_operand.vmem [shape: f32[1,128], index: 4, kind: input, shape index: {}]   ;;  %s1523_s5 = inlined_call_operand.hbm [shape: bf16[128,128], index: 5, kind: input, shape index: {}]   ;;  %s1524_s6 = inlined_call_operand.vmem [shape: f32[1,128], index: 6, kind: input, shape index: {}]   ;;  %s1525_s7 = inlined_call_operand.vmem [shape: f32[1,128], index: 7, kind: input, shape index: {}]   ;;  %s1526_s8 = inlined_call_operand.vmem [shape: f32[1,128], index: 8, kind: input, shape index: {}]   ;;  %s1527_s9 = inlined_call_operand.hbm [shape: bf16[128,128], index: 9, kind: input, shape index: {}]   ;;  %s1528_s10 = inlined_call_operand.vmem [shape: f32[1,128], index: 10, kind: input, shape index: {}]   ;;  %s1529_s11 = inlined_call_operand.hbm [shape: bf16[128,128], index: 11, kind: input, shape index: {}]   ;;  %s1530_s12 = inlined_call_operand.vmem [shape: f32[1,128], index: 12, kind: input, shape index: {}]   ;;  %s1531_s13 = inlined_call_operand.vmem [shape: f32[1,128], index: 13, kind: input, shape index: {}]   ;;  %s1532_s14 = inlined_call_operand.vmem [shape: f32[1,128], index: 14, kind: input, shape index: {}]   ;;  %s1533_s15 = inlined_call_operand.hbm [shape: f32[16,128], index: 15, kind: output, shape index: {}]  }
   0x1   :  { %21 = vsyncpa [#allocation6], 0 }
   0x2   :  { %22 = vsyncpa [#allocation9], 0 }
   0x3   :  { %23 = vsyncpa [#allocation12], 0 }
   0x4   :  { %24 = vsyncpa [#allocation4], 0  ;;  %s1292_s18 = smov [#allocation5]  }
   0x5   :  { %s42_s19 = sshll.u32 %s1292_s18, 4  ;;  %s43_s19 = int_to_ptr.vmem [resolvable:$true] %s42_s19 }
   0x6   :  { %s1150_s20 = scalar_lea.vmem %s43_s19, 1024  ;;  %p1155_p1 = scmp.lt.s32.totalorder %s43_s19, %s43_s19 }
   0x7   :  { %p1151_p0 = scmp.ne.s32.totalorder %s43_s19, %s1150_s20  ;;  %p1156_p2 = scmp.lt.s32.totalorder %s1150_s20, %s1150_s20 }
   0x9   :  { %p1157_p3 = por %p1156_p2, %p1155_p1 }
   0xb   :  { %p1158_p4 = pnand %p1157_p3, %p1151_p0 }
   0xd   :  { %1161 = shalt.err (!%p1158_p4)
}
   0xe   :  { %s1293_s21 = smov 64   ;;  %s1294_s22 = smov 4  }
   0xf   :  { %48 = dma.hbm_to_vmem [thread:$0]  %s1519_s1, 1024, %s43_s19, [#allocation6], %s1293_s21, %s1293_s21, %s1294_s22  }
  0x10   :  { %s1295_s25 = smov [#allocation8]   ;;  %s1296_s27 = smov [#allocation2]  }
  0x11   :  { %s70_s26 = sshll.u32 %s1295_s25, 4  ;;  %s30_s28 = sshll.u32 %s1296_s27, 4  ;;  %s71_s26 = int_to_ptr.vmem [resolvable:$true] %s70_s26  ;;  %s31_s28 = int_to_ptr.vmem [resolvable:$true] %s30_s28 }
  0x12   :  { %s1170_s29 = scalar_lea.vmem %s71_s26, 1024  ;;  %p1175_p6 = scmp.lt.s32.totalorder %s71_s26, %s71_s26 }
  0x13   :  { %p1171_p5 = scmp.ne.s32.totalorder %s71_s26, %s1170_s29  ;;  %p1176_p7 = scmp.lt.s32.totalorder %s1170_s29, %s1170_s29 }
  0x15   :  { %p1177_p8 = por %p1176_p7, %p1175_p6 }
  0x17   :  { %p1178_p9 = pnand %p1177_p8, %p1171_p5 }
  0x19   :  { %1181 = shalt.err (!%p1178_p9)
}
  0x1a   :  { %76 = dma.hbm_to_vmem [thread:$0]  %s1523_s5, 1024, %s71_s26, [#allocation9], %s1293_s21, %s1293_s21, %s1294_s22  }
  0x1b   :  { %s1190_s1 = scalar_lea.vmem %s31_s28, 256  ;;  %p1195_p11 = scmp.lt.s32.totalorder %s31_s28, %s31_s28 }
  0x1c   :  { %p1191_p10 = scmp.ne.s32.totalorder %s31_s28, %s1190_s1  ;;  %p1196_p12 = scmp.lt.s32.totalorder %s1190_s1, %s1190_s1 }
  0x1e   :  { %p1197_p13 = por %p1196_p12, %p1195_p11 }
  0x20   :  { %p1198_p0 = pnand %p1197_p13, %p1191_p10 }
  0x22   :  { %1201 = shalt.err (!%p1198_p0)
}
  0x23   :  { %s1297_s17 = smov 128   ;;  %s1298_s18 = smov 8  }
  0x24   :  { %36 = dma.hbm_to_vmem [thread:$0]  %s1518_s0, 256, %s31_s28, [#allocation3], %s1297_s17, %s1297_s17, %s1298_s18  }
  0x25   :  { %s1299_s23 = smov [#allocation7]   ;;  %s1300_s5 = smov [#allocation10]  }
  0x26   :  { %s56_s24 = sshll.u32 %s1299_s23, 4  ;;  %s88_s25 = sshll.u32 %s1300_s5, 4  ;;  %s57_s24 = int_to_ptr.vmem [resolvable:$true] %s56_s24  ;;  %s89_s25 = int_to_ptr.vmem [resolvable:$true] %s88_s25 }
  0x27   :  { %s1210_s26 = scalar_lea.vmem %s57_s24, 1024  ;;  %p1215_p2 = scmp.lt.s32.totalorder %s57_s24, %s57_s24 }
  0x28   :  { %p1211_p1 = scmp.ne.s32.totalorder %s57_s24, %s1210_s26  ;;  %p1216_p3 = scmp.lt.s32.totalorder %s1210_s26, %s1210_s26 }
  0x2a   :  { %p1217_p4 = por %p1216_p3, %p1215_p2 }
  0x2c   :  { %p1218_p5 = pnand %p1217_p4, %p1211_p1 }
  0x2e   :  { %1221 = shalt.err (!%p1218_p5)
}
  0x2f   :  { %62 = dma.hbm_to_vmem [thread:$0]  %s1521_s3, 1024, %s57_s24, [#allocation6], %s1293_s21, %s1293_s21, %s1294_s22  }
  0x30   :  { %s1230_s0 = scalar_lea.vmem %s89_s25, 1024  ;;  %p1235_p7 = scmp.lt.s32.totalorder %s89_s25, %s89_s25 }
  0x31   :  { %p1231_p6 = scmp.ne.s32.totalorder %s89_s25, %s1230_s0  ;;  %p1236_p8 = scmp.lt.s32.totalorder %s1230_s0, %s1230_s0 }
  0x33   :  { %p1237_p9 = por %p1236_p8, %p1235_p7 }
  0x35   :  { %p1238_p10 = pnand %p1237_p9, %p1231_p6 }
  0x37   :  { %1241 = shalt.err (!%p1238_p10)
}
  0x38   :  { %94 = dma.hbm_to_vmem [thread:$0]  %s1527_s9, 1024, %s89_s25, [#allocation9], %s1293_s21, %s1293_s21, %s1294_s22  }
  0x39   :  { %s1301_s16 = smov [#allocation11]  }
  0x3a   :  { %s102_s1 = sshll.u32 %s1301_s16, 4  ;;  %s103_s1 = int_to_ptr.vmem [resolvable:$true] %s102_s1 }
  0x3b   :  { %s1250_s19 = scalar_lea.vmem %s103_s1, 1024  ;;  %p1255_p12 = scmp.lt.s32.totalorder %s103_s1, %s103_s1 }
  0x3c   :  { %p1251_p11 = scmp.ne.s32.totalorder %s103_s1, %s1250_s19  ;;  %p1256_p13 = scmp.lt.s32.totalorder %s1250_s19, %s1250_s19 }
  0x3e   :  { %p1257_p0 = por %p1256_p13, %p1255_p12 }
  0x40   :  { %p1258_p1 = pnand %p1257_p0, %p1251_p11 }
  0x42   :  { %1261 = shalt.err (!%p1258_p1)
}
  0x43   :  { %108 = dma.hbm_to_vmem [thread:$0]  %s1529_s11, 1024, %s103_s1, [#allocation12], %s1293_s21, %s1293_s21, %s1294_s22  }
  0x44   :  { %1282 = dma.done.wait [#allocation3], 256  }
  0x45   :  { %1283 = vsyncadd [#allocation3], 4294967040 }
  0x46   :  { %1284 = dma.done.wait [#allocation6], 2048  }
  0x47   :  { %1285 = vsyncadd [#allocation6], 4294965248 }
  0x48   :  { %1286 = dma.done.wait [#allocation9], 2048  }
  0x49   :  { %1287 = vsyncadd [#allocation9], 4294965248 }
  0x4a   :  { %1288 = dma.done.wait [#allocation12], 1024  }
  0x4b   :  { %1289 = vsyncadd [#allocation12], 4294966272  ;;  %v1302_v0 = vmov 0.0   ;;  %vm1303_vm0 = vmmov 0   ;;  %v1078_v1 = vld [vmem:[#allocation5 + $0x38] sm:$0xff]   ;;  %v1079_v2 = vld [vmem:[#allocation5 + $0x30] sm:$0xff]  }
  0x4c   :  { %965 = vmatprep.subr.bf16.mxu0 %v1302_v0  ;;  %981 = vmatprep.mubr.msk.bf16.mxu0 %vm1303_vm0, %v1302_v0  ;;  %v1080_v3 = vld [vmem:[#allocation5 + $0x28] sm:$0xff]   ;;  %v1081_v4 = vld [vmem:[#allocation5 + $0x20] sm:$0xff]   ;;  %v1082_v5 = vld [vmem:[#allocation5 + $0x18] sm:$0xff]   ;;  %s1304_s0 = smov [#allocation13]  }
  0x4d   :  { %985 = vmatprep.subr.bf16.mxu1 %v1302_v0  ;;  %1001 = vmatprep.mubr.msk.bf16.mxu1 %vm1303_vm0, %v1302_v0  ;;  %v1083_v6 = vld [vmem:[#allocation5 + $0x10] sm:$0xff]   ;;  %v1084_v7 = vld [vmem:[#allocation5 + $0x8] sm:$0xff]   ;;  %v1085_v8 = vld [vmem:[#allocation5] sm:$0xff]   ;;  %s854_s28 = sshll.u32 %s1304_s0, 4  ;;  %s855_s28 = int_to_ptr.vmem [resolvable:$true] %s854_s28 }
  0x4e   :  { %966 = vmatpush3.bf16.msra.mxu0 %v1078_v1  ;;  %v1433_v9 = vld [vmem:[#allocation2] sm:$0xff]  ;;  %v1435_v10 = vld [vmem:[#allocation2 + $0x8] sm:$0xff]  ;;  %v1088_v14 = vld [vmem:[#allocation7 + $0x28] sm:$0xff]   ;;  %s1262_s30 = scalar_lea.vmem %s855_s28, 256  ;;  %p1267_p3 = scmp.lt.s32.totalorder %s855_s28, %s855_s28 }
  0x4f   :  { %967 = vmatprep.subr.bf16.mxu0 %v1302_v0  ;;  %v136_v11 = vpack.c.bf16 %v1435_v10, %v1433_v9  ;;  %v1086_v12 = vld [vmem:[#allocation7 + $0x38] sm:$0xff]   ;;  %v1087_v13 = vld [vmem:[#allocation7 + $0x30] sm:$0xff]   ;;  %v1089_v15 = vld [vmem:[#allocation7 + $0x20] sm:$0xff]   ;;  %p1263_p2 = scmp.ne.s32.totalorder %s855_s28, %s1262_s30  ;;  %p1268_p4 = scmp.lt.s32.totalorder %s1262_s30, %s1262_s30 }
  0x50   :  { %986 = vmatpush3.bf16.msra.mxu1 %v1086_v12  ;;  %v1090_v16 = vld [vmem:[#allocation7 + $0x18] sm:$0xff]   ;;  %v1091_v17 = vld [vmem:[#allocation7 + $0x10] sm:$0xff]   ;;  %v1092_v18 = vld [vmem:[#allocation7 + $0x8] sm:$0xff]  }
  0x51   :  { %987 = vmatprep.subr.bf16.mxu1 %v1302_v0  ;;  %v1093_v19 = vld [vmem:[#allocation7] sm:$0xff]   ;;  %v869_v20 = vld [vmem:[%s1520_s2] ss:$0 sm:$0xff]  ;;  %v1094_v46 = vld [vmem:[#allocation8 + $0x38] sm:$0xff]   ;;  %p1269_p5 = por %p1268_p4, %p1267_p3 }
  0x52   :  { %968 = vmatpush3.bf16.msra.mxu0 %v1079_v2  ;;  %v1095_v47 = vld [vmem:[#allocation8 + $0x30] sm:$0xff]   ;;  %v1096_v48 = vld [vmem:[#allocation8 + $0x28] sm:$0xff]   ;;  %v1097_v49 = vld [vmem:[#allocation8 + $0x20] sm:$0xff]  }
  0x53   :  { %969 = vmatprep.subr.bf16.mxu0 %v1302_v0  ;;  %v1098_v50 = vld [vmem:[#allocation8 + $0x18] sm:$0xff]   ;;  %v1099_v51 = vld [vmem:[#allocation8 + $0x10] sm:$0xff]   ;;  %v1100_v52 = vld [vmem:[#allocation8 + $0x8] sm:$0xff]   ;;  %p1270_p6 = pnand %p1269_p5, %p1263_p2 }
  0x54   :  { %988 = vmatpush3.bf16.msra.mxu1 %v1087_v13  ;;  %v1101_v53 = vld [vmem:[#allocation8] sm:$0xff]   ;;  %v878_v54 = vld [vmem:[%s1522_s4] ss:$0 sm:$0xff] }
  0x55   :  { %989 = vmatprep.subr.bf16.mxu1 %v1302_v0 }
  0x56   :  { %970 = vmatpush3.bf16.msra.mxu0 %v1080_v3 }
  0x57   :  { %971 = vmatprep.subr.bf16.mxu0 %v1302_v0 }
  0x58   :  { %990 = vmatpush3.bf16.msra.mxu1 %v1088_v14 }
  0x59   :  { %991 = vmatprep.subr.bf16.mxu1 %v1302_v0 }
  0x5a   :  { %972 = vmatpush3.bf16.msra.mxu0 %v1081_v4 }
  0x5b   :  { %973 = vmatprep.subr.bf16.mxu0 %v1302_v0 }
  0x5c   :  { %992 = vmatpush3.bf16.msra.mxu1 %v1089_v15 }
  0x5d   :  { %993 = vmatprep.subr.bf16.mxu1 %v1302_v0 }
  0x5e   :  { %974 = vmatpush3.bf16.msra.mxu0 %v1082_v5 }
  0x5f   :  { %975 = vmatprep.subr.bf16.mxu0 %v1302_v0 }
  0x60   :  { %994 = vmatpush3.bf16.msra.mxu1 %v1090_v16 }
  0x61   :  { %995 = vmatprep.subr.bf16.mxu1 %v1302_v0 }
  0x62   :  { %976 = vmatpush3.bf16.msra.mxu0 %v1083_v6 }
  0x63   :  { %977 = vmatprep.subr.bf16.mxu0 %v1302_v0 }
  0x64   :  { %996 = vmatpush3.bf16.msra.mxu1 %v1091_v17 }
  0x65   :  { %997 = vmatprep.subr.bf16.mxu1 %v1302_v0 }
  0x66   :  { %978 = vmatpush3.bf16.msra.mxu0 %v1084_v7 }
  0x67   :  { %979 = vmatprep.subr.bf16.mxu0 %v1302_v0 }
  0x68   :  { %998 = vmatpush3.bf16.msra.mxu1 %v1092_v18 }
  0x69   :  { %999 = vmatprep.subr.bf16.mxu1 %v1302_v0 }
  0x6a   :  { %980 = vmatpush3.bf16.msra.mxu0 %v1085_v8 }
  0x6b   :  { %1005 = vmatprep.subr.bf16.mxu0 %v1302_v0 }
  0x6c   :  { %1000 = vmatpush3.bf16.msra.mxu1 %v1093_v19 }
  0x6d   :  { %982 = vmatmul.mubr.bf16.vlgmr.msra.gmra.mxu0 %v136_v11  ;;  %1025 = vmatprep.subr.bf16.mxu1 %v1302_v0  ;;  %v889_v11 = vld [vmem:[%s1524_s6] ss:$0 sm:$0xff] }
  0x6e   :  { %1021 = vmatprep.mubr.msk.bf16.mxu0 %vm1303_vm0, %v1302_v0  ;;  %1006 = vmatpush3.bf16.msra.mxu0 %v1094_v46 }
  0x6f   :  { %1007 = vmatprep.subr.bf16.mxu0 %v1302_v0 }
  0x72   :  { %1008 = vmatpush3.bf16.msra.mxu0 %v1095_v47  ;;  %v898_v47 = vld [vmem:[%s1525_s7] ss:$0 sm:$0xff] }
  0x73   :  { %1009 = vmatprep.subr.bf16.mxu0 %v1302_v0 }
  0x76   :  { %1010 = vmatpush3.bf16.msra.mxu0 %v1096_v48 }
  0x77   :  { %1011 = vmatprep.subr.bf16.mxu0 %v1302_v0 }
  0x7a   :  { %1012 = vmatpush3.bf16.msra.mxu0 %v1097_v49 }
  0x7b   :  { %1013 = vmatprep.subr.bf16.mxu0 %v1302_v0 }
  0x7e   :  { %1014 = vmatpush3.bf16.msra.mxu0 %v1098_v50 }
  0x7f   :  { %1015 = vmatprep.subr.bf16.mxu0 %v1302_v0 }
  0x82   :  { %1016 = vmatpush3.bf16.msra.mxu0 %v1099_v51 }
  0x83   :  { %1017 = vmatprep.subr.bf16.mxu0 %v1302_v0 }
  0x86   :  { %1018 = vmatpush3.bf16.msra.mxu0 %v1100_v52  ;;  %v899_v52 = vld [vmem:[%s1526_s8] ss:$0 sm:$0xff] }
  0x87   :  { %1019 = vmatprep.subr.bf16.mxu0 %v1302_v0 }
  0x8a   :  { %1020 = vmatpush3.bf16.msra.mxu0 %v1101_v53 }
  0x8b   :  { %1045 = vmatprep.subr.bf16.mxu0 %v1302_v0 }
 0x12d   :  { %v242_v21 = vpop.f32.mrf.mxu0 }
 0x12e   :  { %v243_v22 = vadd.f32 %v869_v20, %v242_v21 }
 0x12f   :  { %v983_v23 = vpop.f32.mrf.mxu0 }
 0x130   :  { %v249_v24 = vmul.f32 %v243_v22, %v243_v22  ;;  %v1103_v23 = vld [vmem:[#allocation10 + $0x30] sm:$0xff]  }
 0x131   :  { %v245_v25 = vpop.f32.mrf.mxu0 }
 0x132   :  { %v251_v26 = vmul.f32 %v249_v24, %v243_v22  ;;  %v246_v27 = vadd.f32 %v869_v20, %v245_v25  ;;  %v1105_v24 = vld [vmem:[#allocation10 + $0x20] sm:$0xff]   ;;  %v1106_v25 = vld [vmem:[#allocation10 + $0x18] sm:$0xff]  }
 0x133   :  { %v984_v28 = vpop.f32.mrf.mxu0 }
 0x134   :  { %v253_v29 = vmul.f32 0.044715, %v251_v26  ;;  %v250_v30 = vmul.f32 %v246_v27, %v246_v27  ;;  %v1108_v26 = vld [vmem:[#allocation10 + $0x8] sm:$0xff]  }
 0x136   :  { %v255_v31 = vadd.f32 %v253_v29, %v243_v22  ;;  %v252_v32 = vmul.f32 %v250_v30, %v246_v27 }
 0x138   :  { %v257_v33 = vmul.f32 0.7978846, %v255_v31  ;;  %v254_v34 = vmul.f32 0.044715, %v252_v32 }
 0x13a   :  { %1118 = vtanh.f32 %v257_v33  ;;  %v256_v35 = vadd.f32 %v254_v34, %v246_v27 }
 0x13c   :  { %v258_v36 = vmul.f32 0.7978846, %v256_v35 }
 0x13e   :  { %1120 = vtanh.f32 %v258_v36 }
 0x147   :  { %v1119_v37 = vpop.eup %1118 }
 0x148   :  { %v261_v38 = vadd.f32 1.0, %v1119_v37 }
 0x14a   :  { %v263_v41 = vmul.f32 0.5, %v261_v38 }
 0x14b   :  { %v1121_v39 = vpop.eup %1120 }
 0x14c   :  { %v262_v40 = vadd.f32 1.0, %v1121_v39  ;;  %v265_v43 = vmul.f32 %v263_v41, %v243_v22  ;;  %v1102_v22 = vld [vmem:[#allocation10 + $0x38] sm:$0xff]  }
 0x14e   :  { %v264_v42 = vmul.f32 0.5, %v262_v40 }
 0x150   :  { %v266_v44 = vmul.f32 %v264_v42, %v246_v27  ;;  %v1109_v27 = vld [vmem:[#allocation10] sm:$0xff]  }
 0x152   :  { %v267_v45 = vpack.c.bf16 %v266_v44, %v265_v43 }
 0x154   :  { %1002 = vmatmul.mubr.bf16.vlgmr.msra.gmra.mxu1 %v267_v45 }
 0x155   :  { %1041 = vmatprep.mubr.msk.bf16.mxu1 %vm1303_vm0, %v1302_v0  ;;  %1026 = vmatpush3.bf16.msra.mxu1 %v1102_v22 }
 0x156   :  { %1027 = vmatprep.subr.bf16.mxu1 %v1302_v0 }
 0x159   :  { %1028 = vmatpush3.bf16.msra.mxu1 %v1103_v23 }
 0x15a   :  { %1029 = vmatprep.subr.bf16.mxu1 %v1302_v0 }
 0x214   :  { %v373_v55 = vpop.f32.mrf.mxu1 }
 0x215   :  { %v374_v56 = vadd.f32 %v878_v54, %v373_v55 }
 0x216   :  { %v1003_v57 = vpop.f32.mrf.mxu1 }
 0x217   :  { %v887_v58 = vmul.f32 -1.442695, %v374_v56  ;;  %v1110_v57 = vld [vmem:[#allocation11 + $0x38] sm:$0xff]  }
 0x218   :  { %v376_v59 = vpop.f32.mrf.mxu1 }
 0x219   :  { %1122 = vpow2.f32 %v887_v58  ;;  %v377_v60 = vadd.f32 %v878_v54, %v376_v59  ;;  %v1111_v58 = vld [vmem:[#allocation11 + $0x30] sm:$0xff]   ;;  %v1112_v59 = vld [vmem:[#allocation11 + $0x28] sm:$0xff]  }
 0x21a   :  { %v1004_v61 = vpop.f32.mrf.mxu1 }
 0x21b   :  { %v888_v62 = vmul.f32 -1.442695, %v377_v60  ;;  %v1113_v60 = vld [vmem:[#allocation11 + $0x20] sm:$0xff]   ;;  %v1114_v61 = vld [vmem:[#allocation11 + $0x18] sm:$0xff]  }
 0x21d   :  { %1124 = vpow2.f32 %v888_v62  ;;  %v1115_v62 = vld [vmem:[#allocation11 + $0x10] sm:$0xff]  }
 0x226   :  { %v1123_v63 = vpop.eup %1122 }
 0x227   :  { %v386_v1 = vadd.f32 1.0, %v1123_v63  ;;  %v1116_v63 = vld [vmem:[#allocation11 + $0x8] sm:$0xff]  }
 0x229   :  { %1126 = vrcp.f32 %v386_v1  ;;  %v1117_v1 = vld [vmem:[#allocation11] sm:$0xff]  }
 0x22a   :  { %v1125_v2 = vpop.eup %1124 }
 0x22b   :  { %v387_v3 = vadd.f32 1.0, %v1125_v2  ;;  %v900_v2 = vld [vmem:[%s1528_s10] ss:$0 sm:$0xff] }
 0x22d   :  { %1128 = vrcp.f32 %v387_v3 }
 0x236   :  { %v1127_v4 = vpop.eup %1126 }
 0x237   :  { %v392_v6 = vmul.f32 %v1127_v4, %v1433_v9 }
 0x23a   :  { %v1129_v5 = vpop.eup %1128 }
 0x23b   :  { %v393_v7 = vmul.f32 %v1129_v5, %v1435_v10 }
 0x23d   :  { %v394_v8 = vpack.c.bf16 %v393_v7, %v392_v6 }
 0x23f   :  { %1022 = vmatmul.mubr.bf16.vlgmr.msra.gmra.mxu0 %v394_v8 }
 0x240   :  { %1061 = vmatprep.mubr.msk.bf16.mxu0 %vm1303_vm0, %v1302_v0  ;;  %1046 = vmatpush3.bf16.msra.mxu0 %v1110_v57 }
 0x241   :  { %1047 = vmatprep.subr.bf16.mxu0 %v1302_v0 }
 0x244   :  { %1048 = vmatpush3.bf16.msra.mxu0 %v1111_v58  ;;  %v919_v58 = vld [vmem:[%s1532_s14] ss:$0 sm:$0xff] }
 0x245   :  { %1049 = vmatprep.subr.bf16.mxu0 %v1302_v0 }
 0x248   :  { %1050 = vmatpush3.bf16.msra.mxu0 %v1112_v59 }
 0x249   :  { %1051 = vmatprep.subr.bf16.mxu0 %v1302_v0 }
 0x24c   :  { %1052 = vmatpush3.bf16.msra.mxu0 %v1113_v60 }
 0x24d   :  { %1053 = vmatprep.subr.bf16.mxu0 %v1302_v0 }
 0x250   :  { %1054 = vmatpush3.bf16.msra.mxu0 %v1114_v61 }
 0x251   :  { %1055 = vmatprep.subr.bf16.mxu0 %v1302_v0 }
 0x254   :  { %1056 = vmatpush3.bf16.msra.mxu0 %v1115_v62 }
 0x255   :  { %1057 = vmatprep.subr.bf16.mxu0 %v1302_v0 }
 0x258   :  { %1058 = vmatpush3.bf16.msra.mxu0 %v1116_v63 }
 0x259   :  { %1059 = vmatprep.subr.bf16.mxu0 %v1302_v0 }
 0x25c   :  { %1060 = vmatpush3.bf16.msra.mxu0 %v1117_v1 }
 0x2ff   :  { %v500_v12 = vpop.f32.mrf.mxu0 }
 0x300   :  { %v501_v13 = vadd.f32 %v889_v11, %v500_v12 }
 0x301   :  { %v1023_v14 = vpop.f32.mrf.mxu0 }
 0x302   :  { %v507_v15 = vadd.f32 %v501_v13, %v1433_v9  ;;  %v1104_v9 = vld [vmem:[#allocation10 + $0x28] sm:$0xff]  }
 0x303   :  { %v503_v16 = vpop.f32.mrf.mxu0  ;;  %1030 = vmatpush3.bf16.msra.mxu1 %v1104_v9 }
 0x304   :  { %v504_v17 = vadd.f32 %v889_v11, %v503_v16  ;;  %511 = vadd.xlane.f32.xlu0 %v507_v15  ;;  %v517_v18 = vmul.f32 %v507_v15, %v507_v15  ;;  %1031 = vmatprep.subr.bf16.mxu1 %v1302_v0 }
 0x305   :  { %v1024_v19 = vpop.f32.mrf.mxu0 }
 0x306   :  { %v508_v20 = vadd.f32 %v504_v17, %v1435_v10  ;;  %519 = vadd.xlane.f32.xlu1 %v517_v18  ;;  %v1107_v10 = vld [vmem:[#allocation10 + $0x10] sm:$0xff]  }
 0x307   :  { %1032 = vmatpush3.bf16.msra.mxu1 %v1105_v24 }
 0x308   :  { %513 = vadd.xlane.f32.xlu0 %v508_v20  ;;  %v518_v21 = vmul.f32 %v508_v20, %v508_v20  ;;  %1033 = vmatprep.subr.bf16.mxu1 %v1302_v0 }
 0x30a   :  { %521 = vadd.xlane.f32.xlu1 %v518_v21 }
 0x30b   :  { %1034 = vmatpush3.bf16.msra.mxu1 %v1106_v25 }
 0x30c   :  { %1035 = vmatprep.subr.bf16.mxu1 %v1302_v0 }
 0x30f   :  { %1036 = vmatpush3.bf16.msra.mxu1 %v1107_v10 }
 0x310   :  { %1037 = vmatprep.subr.bf16.mxu1 %v1302_v0 }
 0x313   :  { %1038 = vmatpush3.bf16.msra.mxu1 %v1108_v26 }
 0x314   :  { %1039 = vmatprep.subr.bf16.mxu1 %v1302_v0 }
 0x317   :  { %1040 = vmatpush3.bf16.msra.mxu1 %v1109_v27  ;;  %v909_v27 = vld [vmem:[%s1530_s12] ss:$0 sm:$0xff] }
 0x38d   :  { %v512_v28 = vpop.xlane.xlu0 %511 }
 0x38e   :  { %v515_v29 = vmul.f32 0.03125, %v512_v28 }
 0x38f   :  { %v520_v30 = vpop.xlane.xlu1 %519 }
 0x390   :  { %v525_v31 = vmul.f32 %v515_v29, %v515_v29  ;;  %v523_v32 = vmul.f32 0.03125, %v520_v30  ;;  %v535_v44 = vsub.f32 %v507_v15, %v515_v29 }
 0x391   :  { %v514_v33 = vpop.xlane.xlu0 %513 }
 0x392   :  { %v527_v34 = vsub.f32 %v523_v32, %v525_v31  ;;  %v516_v35 = vmul.f32 0.03125, %v514_v33 }
 0x393   :  { %v522_v36 = vpop.xlane.xlu1 %521 }
 0x394   :  { %v529_v37 = vmax.f32 %v527_v34, 0.0  ;;  %v526_v38 = vmul.f32 %v516_v35, %v516_v35  ;;  %v524_v39 = vmul.f32 0.03125, %v522_v36  ;;  %v536_v48 = vsub.f32 %v508_v20, %v516_v35 }
 0x396   :  { %v531_v40 = vadd.f32 1e-06, %v529_v37  ;;  %v528_v41 = vsub.f32 %v524_v39, %v526_v38 }
 0x398   :  { %1130 = vrsqrt.f32 %v531_v40  ;;  %v530_v42 = vmax.f32 %v528_v41, 0.0 }
 0x39a   :  { %v532_v43 = vadd.f32 1e-06, %v530_v42 }
 0x39c   :  { %1132 = vrsqrt.f32 %v532_v43 }
 0x3a5   :  { %v1131_v45 = vpop.eup %1130 }
 0x3a6   :  { %v537_v46 = vmul.f32 %v1131_v45, %v535_v44 }
 0x3a8   :  { %v545_v51 = vmul.f32 %v898_v47, %v537_v46 }
 0x3a9   :  { %v1133_v49 = vpop.eup %1132 }
 0x3aa   :  { %v538_v50 = vmul.f32 %v1133_v49, %v536_v48  ;;  %v553_v54 = vadd.f32 %v899_v52, %v545_v51 }
 0x3ac   :  { %v546_v53 = vmul.f32 %v898_v47, %v538_v50 }
 0x3ae   :  { %v1489_v55 = vadd.f32 %v899_v52, %v546_v53 }
 0x3b0   :  { %v555_v56 = vpack.c.bf16 %v1489_v55, %v553_v54 }
 0x3b2   :  { %1042 = vmatmul.mubr.bf16.vlgmr.msra.gmra.mxu1 %v555_v56  ;;  %v918_v56 = vld [vmem:[%s1531_s13] ss:$0 sm:$0xff] }
 0x472   :  { %v661_v3 = vpop.f32.mrf.mxu1 }
 0x473   :  { %v662_v4 = vadd.f32 %v900_v2, %v661_v3 }
 0x474   :  { %v1043_v5 = vpop.f32.mrf.mxu1 }
 0x475   :  { %v668_v6 = vmul.f32 %v662_v4, %v662_v4 }
 0x476   :  { %v664_v7 = vpop.f32.mrf.mxu1 }
 0x477   :  { %v670_v8 = vmul.f32 %v668_v6, %v662_v4  ;;  %v665_v11 = vadd.f32 %v900_v2, %v664_v7 }
 0x478   :  { %v1044_v12 = vpop.f32.mrf.mxu1 }
 0x479   :  { %v672_v13 = vmul.f32 0.044715, %v670_v8  ;;  %v669_v14 = vmul.f32 %v665_v11, %v665_v11 }
 0x47b   :  { %v674_v15 = vadd.f32 %v672_v13, %v662_v4  ;;  %v671_v16 = vmul.f32 %v669_v14, %v665_v11 }
 0x47d   :  { %v676_v17 = vmul.f32 0.7978846, %v674_v15  ;;  %v673_v0 = vmul.f32 0.044715, %v671_v16 }
 0x47f   :  { %1134 = vtanh.f32 %v676_v17  ;;  %v675_v18 = vadd.f32 %v673_v0, %v665_v11 }
 0x481   :  { %v677_v19 = vmul.f32 0.7978846, %v675_v18 }
 0x483   :  { %1136 = vtanh.f32 %v677_v19 }
 0x48c   :  { %v1135_v20 = vpop.eup %1134 }
 0x48d   :  { %v680_v21 = vadd.f32 1.0, %v1135_v20 }
 0x48f   :  { %v682_v23 = vmul.f32 0.5, %v680_v21 }
 0x490   :  { %v1137_v22 = vpop.eup %1136 }
 0x491   :  { %v681_v9 = vadd.f32 1.0, %v1137_v22  ;;  %v684_v25 = vmul.f32 %v682_v23, %v662_v4 }
 0x493   :  { %v683_v24 = vmul.f32 0.5, %v681_v9 }
 0x495   :  { %v685_v10 = vmul.f32 %v683_v24, %v665_v11 }
 0x497   :  { %v686_v26 = vpack.c.bf16 %v685_v10, %v684_v25 }
 0x499   :  { %1062 = vmatmul.mubr.bf16.vlgmr.msra.gmra.mxu0 %v686_v26 }
 0x559   :  { %v792_v28 = vpop.f32.mrf.mxu0 }
 0x55a   :  { %v793_v29 = vadd.f32 %v909_v27, %v792_v28 }
 0x55b   :  { %v1063_v30 = vpop.f32.mrf.mxu0 }
 0x55c   :  { %v799_v31 = vadd.f32 %v793_v29, %v553_v54 }
 0x55d   :  { %v795_v32 = vpop.f32.mrf.mxu0 }
 0x55e   :  { %v796_v33 = vadd.f32 %v909_v27, %v795_v32  ;;  %803 = vadd.xlane.f32.xlu0 %v799_v31  ;;  %v809_v36 = vmul.f32 %v799_v31, %v799_v31 }
 0x55f   :  { %v1064_v34 = vpop.f32.mrf.mxu0 }
 0x560   :  { %v800_v35 = vadd.f32 %v796_v33, %v1489_v55 }
 0x562   :  { %811 = vadd.xlane.f32.xlu0 %v809_v36  ;;  %805 = vadd.xlane.f32.xlu1 %v800_v35  ;;  %v810_v37 = vmul.f32 %v800_v35, %v800_v35 }
 0x566   :  { %813 = vadd.xlane.f32.xlu1 %v810_v37 }
 0x5e7   :  { %v804_v38 = vpop.xlane.xlu0 %803 }
 0x5e8   :  { %v807_v39 = vmul.f32 0.03125, %v804_v38 }
 0x5ea   :  { %v817_v42 = vmul.f32 %v807_v39, %v807_v39  ;;  %v827_v54 = vsub.f32 %v799_v31, %v807_v39 }
 0x5eb   :  { %v812_v40 = vpop.xlane.xlu0 %811  ;;  %v806_v41 = vpop.xlane.xlu1 %805 }
 0x5ec   :  { %v815_v43 = vmul.f32 0.03125, %v812_v40  ;;  %v808_v44 = vmul.f32 0.03125, %v806_v41 }
 0x5ee   :  { %v819_v45 = vsub.f32 %v815_v43, %v817_v42  ;;  %v818_v48 = vmul.f32 %v808_v44, %v808_v44  ;;  %v828_v59 = vsub.f32 %v800_v35, %v808_v44 }
 0x5ef   :  { %v814_v46 = vpop.xlane.xlu1 %813 }
 0x5f0   :  { %v821_v47 = vmax.f32 %v819_v45, 0.0  ;;  %v816_v49 = vmul.f32 0.03125, %v814_v46 }
 0x5f2   :  { %v823_v50 = vadd.f32 1e-06, %v821_v47  ;;  %v820_v51 = vsub.f32 %v816_v49, %v818_v48 }
 0x5f4   :  { %1138 = vrsqrt.f32 %v823_v50  ;;  %v822_v52 = vmax.f32 %v820_v51, 0.0 }
 0x5f6   :  { %v824_v53 = vadd.f32 1e-06, %v822_v52 }
 0x5f8   :  { %1140 = vrsqrt.f32 %v824_v53 }
 0x601   :  { %v1139_v55 = vpop.eup %1138 }
 0x602   :  { %v829_v57 = vmul.f32 %v1139_v55, %v827_v54 }
 0x604   :  { %v837_v60 = vmul.f32 %v918_v56, %v829_v57 }
 0x605   :  { %v1141_v61 = vpop.eup %1140 }
 0x606   :  { %v830_v62 = vmul.f32 %v1141_v61, %v828_v59  ;;  %v845_v63 = vadd.f32 %v919_v58, %v837_v60 }
 0x608   :  { %v838_v1 = vmul.f32 %v918_v56, %v830_v62  ;;  %847 = vst [vmem:[#allocation13] sm:$0xff] %v845_v63 }
 0x60a   :  { %v846_v2 = vadd.f32 %v919_v58, %v838_v1 }
 0x60c   :  { %848 = vst [vmem:[#allocation13 + $0x8] sm:$0xff] %v846_v2 }
 0x60d   :  { %1273 = shalt.err (!%p1270_p6)
}
 0x60e   :  { %860 = dma.vmem_to_hbm [thread:$0]  %s855_s28, 256, %s1533_s15, [#allocation4], %s1297_s17, %s1297_s17, %s1298_s18  }
 0x60f   :  { %1290 = dma.done.wait [#allocation4], 256  }
 0x610   :  { %1291 = vsyncadd [#allocation4], 4294967040 }
 0x611   :  { %864 = vsyncpa [#allocation3], 1 }
 0x612   :  { %865 = vsyncpa [#allocation6], 1 }
 0x613   :  { %866 = vsyncpa [#allocation9], 1 }
 0x614   :  { %867 = vsyncpa [#allocation12], 1 }
 0x615   :  { %868 = vsyncpa [#allocation4], 1 }

</bundles_post_ra>
